<compile_context>
chip_gen: v5e
topology: v5e:2x2
jax: 0.10.0
libtpu: 0.0.40
codegen_flags: <defaults>
</compile_context>

<pallas_src>
import functools
import math

import jax
import jax.numpy as jnp
from jax import lax
from jax.experimental import pallas as pl
from jax.experimental.pallas import tpu as pltpu


def _injector_kernel(num_heads, eps, mxu_dtype,
                     img_ref,    # (C, L)      image tile, lane-dense spatial axis
                     kbd_ref,    # (NH*T, C)   scaled block-diagonal K (per batch)
                     wov_ref,    # (C, NH*T)   fused Wo_h @ V_h^T      (per batch)
                     wq_ref,     # (C, C)      query projection weight
                     col_ref,    # (C, 8)      packed per-channel columns (f32)
                     o_ref):     # (C, L)
    D, L = img_ref.shape
    NHT = kbd_ref.shape[0]
    T = NHT // num_heads
    f32 = jnp.float32

    x = img_ref[...].astype(f32)                                   # (D, L)
    cols = col_ref[...]                                            # (D, 8)
    inw, inb, bq = cols[:, 0:1], cols[:, 1:2], cols[:, 2:3]
    gamma, gbo = cols[:, 3:4], cols[:, 4:5]

    # ---- image LayerNorm over channels (axis 0), per spatial position ----
    imu = jnp.mean(x, axis=0, keepdims=True)                       # (1, L)
    ivar = jnp.mean((x - imu) ** 2, axis=0, keepdims=True)         # (1, L)
    i_n = (x - imu) * lax.rsqrt(ivar + eps) * inw + inb            # (D, L) f32

    # ---- Q^T (D, L): bf16 MXU operands, f32 accumulation ----
    qt = jnp.dot(wq_ref[...], i_n.astype(mxu_dtype),
                 preferred_element_type=f32) + bq

    # ---- all heads' scores in one matmul: (NH*T, L); scale folded into K_bd
    s = jnp.dot(kbd_ref[...], qt.astype(mxu_dtype),
                preferred_element_type=f32)
    s = s.reshape(num_heads, T, L)
    m = jnp.max(s, axis=1, keepdims=True)                          # (NH, 1, L)
    e = jnp.exp(s - m)
    p = e * pl.reciprocal(jnp.sum(e, axis=1, keepdims=True), approx=True)

    # ---- attention output + out-projection + head-sum in one matmul ----
    attn = jnp.dot(wov_ref[...], p.reshape(NHT, L).astype(mxu_dtype),
                   preferred_element_type=f32)                     # (D, L)

    # residual on the NORMALIZED image features; gamma*bo pre-folded (gbo)
    out = i_n + gamma * attn + gbo
    o_ref[...] = out.astype(o_ref.dtype)


def _round_up(x, m):
    return (x + m - 1) // m * m


@functools.partial(jax.jit, static_argnames=("num_heads", "tile_hw",
                                             "image_buffers", "use_bf16_mxu"))
def injector_forward(image_features, text_features, params, num_heads=8,
                     tile_hw=512, image_buffers=None, use_bf16_mxu=True):
    """image_features: (B, C, H, W) f32; text_features: (B, T, TFD) f32.
    params: PyTorch-layout weights (see __main__). Returns (B, C, H, W)."""
    (wtp, btp, tnw, tnb, inw, inb,
     wq, bq, wk, bk, wv, bv, wo, bo, gamma) = params
    B, C, H, W = image_features.shape
    D = C
    HW = H * W
    T = text_features.shape[1]
    assert D % num_heads == 0 and tile_hw % 128 == 0
    hd = D // num_heads
    scale = 1.0 / math.sqrt(hd)
    eps = 1e-5
    f32 = jnp.float32
    mxu_dtype = jnp.bfloat16 if use_bf16_mxu else f32

    # ---- text-side work depends only on b: hoisted out of the kernel ----
    tp = jnp.einsum('btf,df->btd', text_features, wtp,
                    preferred_element_type=f32) + btp               # (B, T, D)
    tmu = jnp.mean(tp, axis=-1, keepdims=True)
    tvar = jnp.mean((tp - tmu) ** 2, axis=-1, keepdims=True)
    t_n = (tp - tmu) * lax.rsqrt(tvar + eps) * tnw + tnb

    k = jnp.einsum('btd,ed->bte', t_n, wk, preferred_element_type=f32) + bk
    v = jnp.einsum('btd,ed->bte', t_n, wv, preferred_element_type=f32) + bv

    k_heads = k.reshape(B, T, num_heads, hd).transpose(0, 2, 1, 3)  # (B,NH,T,hd)
    v_heads = v.reshape(B, T, num_heads, hd).transpose(0, 2, 1, 3)  # (B,NH,T,hd)

    # scaled block-diagonal K: (B, NH*T, D)
    eye = jnp.eye(num_heads, dtype=f32)
    kbd = jnp.einsum('bhtd,hg->bhtgd', k_heads * scale, eye).reshape(
        B, num_heads * T, D)
    # fused output-projection weights: Wov[b, :, h*T+t] = (Wo_h @ V_h^T)[:, t]
    wo_heads = wo.reshape(D, num_heads, hd)
    wov = jnp.einsum('ehd,bhtd->beht', wo_heads, v_heads).reshape(
        B, D, num_heads * T)

    kbd = kbd.astype(mxu_dtype)
    wov = wov.astype(mxu_dtype)
    wq_m = wq.astype(mxu_dtype)

    # packed per-channel column vectors -> one resident lane-dense tile
    col = lambda a: a.reshape(D, 1).astype(f32)
    colpack = jnp.concatenate(
        [col(inw), col(inb), col(bq), col(gamma), col(gamma * bo),
         jnp.zeros((D, 3), f32)], axis=1)                           # (D, 8)

    # ---- tiling: lane-dense HW tiles; pad HW rather than fall back ----
    tile = min(tile_hw, _round_up(HW, 128))
    hw_pad = _round_up(HW, tile)
    x = image_features.reshape(B, C, HW)         # free reshape, no transpose
    if hw_pad != HW:
        x = jnp.pad(x, ((0, 0), (0, 0), (0, hw_pad - HW)))
    n_hw = hw_pad // tile

    img_spec_kwargs = {}
    if image_buffers is not None:                # e.g. 3 on v5e if DMA exposed
        img_spec_kwargs = dict(pipeline_mode=pl.Buffered(image_buffers))

    kernel = functools.partial(_injector_kernel, num_heads, eps, mxu_dtype)

    out = pl.pallas_call(
        kernel,
        out_shape=jax.ShapeDtypeStruct((B, C, hw_pad), image_features.dtype),
        grid_spec=pltpu.PrefetchScalarGridSpec(
            num_scalar_prefetch=0,
            grid=(B, n_hw),
            in_specs=[
                pl.BlockSpec((None, C, tile), lambda b, t: (b, 0, t),
                             **img_spec_kwargs),
                pl.BlockSpec((None, num_heads * T, D), lambda b, t: (b, 0, 0)),
                pl.BlockSpec((None, D, num_heads * T), lambda b, t: (b, 0, 0)),
                pl.BlockSpec((D, D), lambda b, t: (0, 0)),
                pl.BlockSpec((D, 8), lambda b, t: (0, 0)),
            ],
            out_specs=pl.BlockSpec((None, C, tile), lambda b, t: (b, 0, t)),
        ),
        compiler_params=pltpu.CompilerParams(
            dimension_semantics=("parallel", "parallel"),
            vmem_limit_bytes=32 * 1024 * 1024,
        ),
    )(x, kbd, wov, wq_m, colpack)

    if hw_pad != HW:
        out = out[:, :, :HW]
    return out.reshape(B, C, H, W)


# ---------------- pure-JAX reference (mirrors the PyTorch module) ----------------

def _layer_norm_ref(x, w, b, eps=1e-5):
    mu = jnp.mean(x, axis=-1, keepdims=True)
    var = jnp.mean((x - mu) ** 2, axis=-1, keepdims=True)
    return (x - mu) * lax.rsqrt(var + eps) * w + b


def _ref_forward(image_features, text_features, params, num_heads=8):
    (wtp, btp, tnw, tnb, inw, inb,
     wq, bq, wk, bk, wv, bv, wo, bo, gamma) = params
    B, C, H, W = image_features.shape
    D = C
    HW = H * W
    T = text_features.shape[1]
    hd = D // num_heads

    x = image_features.reshape(B, C, HW).transpose(0, 2, 1)          # (B, HW, D)
    t = jnp.einsum('btf,df->btd', text_features, wtp) + btp          # (B, T, D)
    t = _layer_norm_ref(t, tnw, tnb)
    x = _layer_norm_ref(x, inw, inb)

    q = jnp.einsum('bld,ed->ble', x, wq) + bq
    k = jnp.einsum('btd,ed->bte', t, wk) + bk
    v = jnp.einsum('btd,ed->bte', t, wv) + bv

    qh = q.reshape(B, HW, num_heads, hd).transpose(0, 2, 1, 3)
    kh = k.reshape(B, T, num_heads, hd).transpose(0, 2, 1, 3)
    vh = v.reshape(B, T, num_heads, hd).transpose(0, 2, 1, 3)

    s = jnp.einsum('bhqd,bhkd->bhqk', qh, kh) / math.sqrt(hd)
    p = jax.nn.softmax(s, axis=-1)
    o = jnp.einsum('bhqk,bhkd->bhqd', p, vh)
    o = o.transpose(0, 2, 1, 3).reshape(B, HW, D)

    attn = jnp.einsum('bld,ed->ble', o, wo) + bo
    out = x + gamma * attn
    return out.transpose(0, 2, 1).reshape(B, C, H, W)


if __name__ == "__main__":
    # dim must be divisible by num_attn_head (8); head_dim = 4.
    B, C, H, W = 2, 32, 16, 16
    T, TFD = 8, 64
    NH = 8

    key = jax.random.PRNGKey(0)
    ks = jax.random.split(key, 18)
    f = jnp.float32

    img = jax.random.normal(ks[0], (B, C, H, W), f)
    txt = jax.random.normal(ks[1], (B, T, TFD), f)

    params = (
        jax.random.normal(ks[2], (C, TFD), f) * 0.1,    # text_feature_dim_proj.weight (D, TFD)
        jax.random.normal(ks[3], (C,), f) * 0.1,        # text_feature_dim_proj.bias
        1.0 + 0.1 * jax.random.normal(ks[4], (C,), f),  # text_norm.weight
        0.1 * jax.random.normal(ks[5], (C,), f),        # text_norm.bias
        1.0 + 0.1 * jax.random.normal(ks[6], (C,), f),  # image_norm.weight
        0.1 * jax.random.normal(ks[7], (C,), f),        # image_norm.bias
        jax.random.normal(ks[8], (C, C), f) * 0.1,      # Wq (in_proj rows 0:D)
        jax.random.normal(ks[9], (C,), f) * 0.1,        # bq
        jax.random.normal(ks[10], (C, C), f) * 0.1,     # Wk
        jax.random.normal(ks[11], (C,), f) * 0.1,       # bk
        jax.random.normal(ks[12], (C, C), f) * 0.1,     # Wv
        jax.random.normal(ks[13], (C,), f) * 0.1,       # bv
        jax.random.normal(ks[14], (C, C), f) * 0.1,     # out_proj.weight
        jax.random.normal(ks[15], (C,), f) * 0.1,       # out_proj.bias
        # gamma is zero-initialized in the module; use nonzero values here so the
        # attention path is actually exercised by the check.
        jax.random.normal(ks[16], (C,), f) * 0.5,       # gamma
    )

    y = injector_forward(img, txt, params, num_heads=NH)
    y = jax.block_until_ready(y)

    y_ref = _ref_forward(img, txt, params, num_heads=NH)
    assert y.shape == img.shape and y.dtype == img.dtype
    # bf16 MXU operands (f32 accumulation) -> allow ~1e-2-level deltas vs f32 ref
    assert jnp.allclose(y, y_ref, atol=3e-2, rtol=3e-2), (
        "mismatch vs reference: max abs err = %g"
        % float(jnp.max(jnp.abs(y - y_ref))))

    print("KERNEL_OK")
</pallas_src>

<mosaic_0001>
module attributes {stable_mosaic.version = 11 : i64} {
  func.func @_injector_kernel(%arg0: i32, %arg1: i32, %arg2: memref<1x32x256xf32, #tpu.memory_space<vmem>>, %arg3: memref<1x64x32xbf16, #tpu.memory_space<vmem>>, %arg4: memref<1x32x64xbf16, #tpu.memory_space<vmem>>, %arg5: memref<32x32xbf16, #tpu.memory_space<vmem>>, %arg6: memref<32x8xf32, #tpu.memory_space<vmem>>, %arg7: memref<1x32x256xf32, #tpu.memory_space<vmem>>) attributes {dimension_semantics = [#tpu.dimension_semantics<parallel>, #tpu.dimension_semantics<parallel>], iteration_bounds = array<i64: 2, 1>, scalar_prefetch = 0 : i64, scratch_operands = 0 : i64, tpu.core_type = #tpu.core_type<tc>, window_params = [{transform_indices = @transform_0, window_bounds = array<i64: 1, 32, 256>}, {transform_indices = @transform_1, window_bounds = array<i64: 1, 64, 32>}, {transform_indices = @transform_2, window_bounds = array<i64: 1, 32, 64>}, {pipeline_mode = #tpu.pipeline_mode<synchronous>, transform_indices = @transform_3, window_bounds = array<i64: 32, 32>}, {pipeline_mode = #tpu.pipeline_mode<synchronous>, transform_indices = @transform_4, window_bounds = array<i64: 32, 8>}, {transform_indices = @transform_5, window_bounds = array<i64: 1, 32, 256>}]} {
    %c0 = arith.constant 0 : index
    %c0_0 = arith.constant 0 : index
    %c0_1 = arith.constant 0 : index
    %0 = vector.load %arg2[%c0, %c0_0, %c0_1] : memref<1x32x256xf32, #tpu.memory_space<vmem>>, vector<1x32x256xf32>
    %1 = vector.shape_cast %0 : vector<1x32x256xf32> to vector<32x256xf32>
    %c0_2 = arith.constant 0 : index
    %c0_3 = arith.constant 0 : index
    %2 = vector.load %arg6[%c0_2, %c0_3] : memref<32x8xf32, #tpu.memory_space<vmem>>, vector<32x8xf32>
    %3 = vector.extract_strided_slice %2 {offsets = [0, 0], sizes = [32, 1], strides = [1, 1]} : vector<32x8xf32> to vector<32x1xf32>
    %4 = vector.extract_strided_slice %2 {offsets = [0, 1], sizes = [32, 1], strides = [1, 1]} : vector<32x8xf32> to vector<32x1xf32>
    %5 = vector.extract_strided_slice %2 {offsets = [0, 2], sizes = [32, 1], strides = [1, 1]} : vector<32x8xf32> to vector<32x1xf32>
    %6 = vector.extract_strided_slice %2 {offsets = [0, 3], sizes = [32, 1], strides = [1, 1]} : vector<32x8xf32> to vector<32x1xf32>
    %7 = vector.extract_strided_slice %2 {offsets = [0, 4], sizes = [32, 1], strides = [1, 1]} : vector<32x8xf32> to vector<32x1xf32>
    %cst = arith.constant dense<0.000000e+00> : vector<256xf32>
    %8 = vector.multi_reduction <add>, %1, %cst [0] : vector<32x256xf32> to vector<256xf32>
    %9 = vector.shape_cast %8 : vector<256xf32> to vector<1x256xf32>
    %cst_4 = arith.constant 3.200000e+01 : f32
    %10 = vector.broadcast %cst_4 : f32 to vector<1x256xf32>
    %11 = arith.divf %9, %10 : vector<1x256xf32>
    %12 = vector.broadcast %11 : vector<1x256xf32> to vector<32x256xf32>
    %13 = arith.subf %1, %12 : vector<32x256xf32>
    %14 = arith.mulf %13, %13 : vector<32x256xf32>
    %cst_5 = arith.constant dense<0.000000e+00> : vector<256xf32>
    %15 = vector.multi_reduction <add>, %14, %cst_5 [0] : vector<32x256xf32> to vector<256xf32>
    %16 = vector.shape_cast %15 : vector<256xf32> to vector<1x256xf32>
    %cst_6 = arith.constant 3.200000e+01 : f32
    %17 = vector.broadcast %cst_6 : f32 to vector<1x256xf32>
    %18 = arith.divf %16, %17 : vector<1x256xf32>
    %19 = vector.broadcast %11 : vector<1x256xf32> to vector<32x256xf32>
    %20 = arith.subf %1, %19 : vector<32x256xf32>
    %cst_7 = arith.constant 9.99999974E-6 : f32
    %21 = vector.broadcast %cst_7 : f32 to vector<1x256xf32>
    %22 = arith.addf %18, %21 : vector<1x256xf32>
    %23 = math.rsqrt %22 : vector<1x256xf32>
    %24 = vector.broadcast %23 : vector<1x256xf32> to vector<32x256xf32>
    %25 = arith.mulf %20, %24 : vector<32x256xf32>
    %26 = vector.broadcast %3 : vector<32x1xf32> to vector<32x256xf32>
    %27 = arith.mulf %25, %26 : vector<32x256xf32>
    %28 = vector.broadcast %4 : vector<32x1xf32> to vector<32x256xf32>
    %29 = arith.addf %27, %28 : vector<32x256xf32>
    %c0_8 = arith.constant 0 : index
    %c0_9 = arith.constant 0 : index
    %30 = vector.load %arg5[%c0_8, %c0_9] : memref<32x32xbf16, #tpu.memory_space<vmem>>, vector<32x32xbf16>
    %31 = arith.truncf %29 : vector<32x256xf32> to vector<32x256xbf16>
    %cst_10 = arith.constant dense<0.000000e+00> : vector<32x256xf32>
    %32 = tpu.matmul %30, %31, %cst_10 {dimension_numbers = #tpu.dot_dimension_numbers<[1], [0], [0], [1], [0, 0, 1, 1], [], []>} : vector<32x32xbf16>, vector<32x256xbf16>, vector<32x256xf32> -> vector<32x256xf32>
    %33 = vector.broadcast %5 : vector<32x1xf32> to vector<32x256xf32>
    %34 = arith.addf %32, %33 : vector<32x256xf32>
    %c0_11 = arith.constant 0 : index
    %c0_12 = arith.constant 0 : index
    %c0_13 = arith.constant 0 : index
    %35 = vector.load %arg3[%c0_11, %c0_12, %c0_13] : memref<1x64x32xbf16, #tpu.memory_space<vmem>>, vector<1x64x32xbf16>
    %36 = vector.shape_cast %35 : vector<1x64x32xbf16> to vector<64x32xbf16>
    %37 = arith.truncf %34 : vector<32x256xf32> to vector<32x256xbf16>
    %cst_14 = arith.constant dense<0.000000e+00> : vector<64x256xf32>
    %38 = tpu.matmul %36, %37, %cst_14 {dimension_numbers = #tpu.dot_dimension_numbers<[1], [0], [0], [1], [0, 0, 1, 1], [], []>} : vector<64x32xbf16>, vector<32x256xbf16>, vector<64x256xf32> -> vector<64x256xf32>
    %39 = vector.shape_cast %38 : vector<64x256xf32> to vector<8x8x256xf32>
    %cst_15 = arith.constant dense<0xFF800000> : vector<8x256xf32>
    %40 = vector.multi_reduction <maximumf>, %39, %cst_15 [1] : vector<8x8x256xf32> to vector<8x256xf32>
    %41 = vector.shape_cast %40 : vector<8x256xf32> to vector<8x1x256xf32>
    %42 = vector.broadcast %41 : vector<8x1x256xf32> to vector<8x8x256xf32>
    %43 = arith.subf %39, %42 : vector<8x8x256xf32>
    %44 = math.exp %43 : vector<8x8x256xf32>
    %cst_16 = arith.constant dense<0.000000e+00> : vector<8x256xf32>
    %45 = vector.multi_reduction <add>, %44, %cst_16 [1] : vector<8x8x256xf32> to vector<8x256xf32>
    %46 = vector.shape_cast %45 : vector<8x256xf32> to vector<8x1x256xf32>
    %47 = tpu.reciprocal %46 {approx = true} : vector<8x1x256xf32> -> vector<8x1x256xf32>
    %48 = vector.broadcast %47 : vector<8x1x256xf32> to vector<8x8x256xf32>
    %49 = arith.mulf %44, %48 : vector<8x8x256xf32>
    %c0_17 = arith.constant 0 : index
    %c0_18 = arith.constant 0 : index
    %c0_19 = arith.constant 0 : index
    %50 = vector.load %arg4[%c0_17, %c0_18, %c0_19] : memref<1x32x64xbf16, #tpu.memory_space<vmem>>, vector<1x32x64xbf16>
    %51 = vector.shape_cast %50 : vector<1x32x64xbf16> to vector<32x64xbf16>
    %52 = vector.shape_cast %49 : vector<8x8x256xf32> to vector<64x256xf32>
    %53 = arith.truncf %52 : vector<64x256xf32> to vector<64x256xbf16>
    %cst_20 = arith.constant dense<0.000000e+00> : vector<32x256xf32>
    %54 = tpu.matmul %51, %53, %cst_20 {dimension_numbers = #tpu.dot_dimension_numbers<[1], [0], [0], [1], [0, 0, 1, 1], [], []>} : vector<32x64xbf16>, vector<64x256xbf16>, vector<32x256xf32> -> vector<32x256xf32>
    %55 = vector.broadcast %6 : vector<32x1xf32> to vector<32x256xf32>
    %56 = arith.mulf %55, %54 : vector<32x256xf32>
    %57 = arith.addf %29, %56 : vector<32x256xf32>
    %58 = vector.broadcast %7 : vector<32x1xf32> to vector<32x256xf32>
    %59 = arith.addf %57, %58 : vector<32x256xf32>
    %c0_21 = arith.constant 0 : index
    %c0_22 = arith.constant 0 : index
    %c0_23 = arith.constant 0 : index
    %60 = vector.load %arg7[%c0_21, %c0_22, %c0_23] : memref<1x32x256xf32, #tpu.memory_space<vmem>>, vector<1x32x256xf32>
    %61 = vector.shape_cast %60 : vector<1x32x256xf32> to vector<32x256xf32>
    %62 = vector.shape_cast %59 : vector<32x256xf32> to vector<1x32x256xf32>
    tpu.vector_store %arg7[%c0_21, %c0_22, %c0_23], %62 {strides = array<i32>} : memref<1x32x256xf32, #tpu.memory_space<vmem>>, vector<1x32x256xf32>,
    return
  }
  func.func @transform_0(%arg0: i32, %arg1: i32) -> (i32, i32, i32) {
    %c0_i32 = arith.constant 0 : i32
    %c0_i32_0 = arith.constant 0 : i32
    return %arg0, %c0_i32, %arg1 : i32, i32, i32
  }
  func.func @transform_1(%arg0: i32, %arg1: i32) -> (i32, i32, i32) {
    %c0_i32 = arith.constant 0 : i32
    %c0_i32_0 = arith.constant 0 : i32
    %c0_i32_1 = arith.constant 0 : i32
    return %arg0, %c0_i32, %c0_i32_0 : i32, i32, i32
  }
  func.func @transform_2(%arg0: i32, %arg1: i32) -> (i32, i32, i32) {
    %c0_i32 = arith.constant 0 : i32
    %c0_i32_0 = arith.constant 0 : i32
    %c0_i32_1 = arith.constant 0 : i32
    return %arg0, %c0_i32, %c0_i32_0 : i32, i32, i32
  }
  func.func @transform_3(%arg0: i32, %arg1: i32) -> (i32, i32) {
    %c0_i32 = arith.constant 0 : i32
    %c0_i32_0 = arith.constant 0 : i32
    %c0_i32_1 = arith.constant 0 : i32
    return %c0_i32, %c0_i32_0 : i32, i32
  }
  func.func @transform_4(%arg0: i32, %arg1: i32) -> (i32, i32) {
    %c0_i32 = arith.constant 0 : i32
    %c0_i32_0 = arith.constant 0 : i32
    %c0_i32_1 = arith.constant 0 : i32
    return %c0_i32, %c0_i32_0 : i32, i32
  }
  func.func @transform_5(%arg0: i32, %arg1: i32) -> (i32, i32, i32) {
    %c0_i32 = arith.constant 0 : i32
    %c0_i32_0 = arith.constant 0 : i32
    return %arg0, %c0_i32, %arg1 : i32, i32, i32
  }
}

</mosaic_0001>

<bundles_post_ra>
// kernel: injector_forward.1
= control target key start
LH: loop header
LB: loop body
LE: loop exit
PB: predicated region body
PF: predicated region fallthrough
CT: control target
= control target key end

     0   :  { %s1407_s18 = smov 0   ;;  %s1409_s19 = smov 0   ;;  %s1725_s0 = inlined_call_operand.vmem [shape: f32[2,32,256], index: 0, kind: input, shape index: {}]   ;;  %s1726_s1 = inlined_call_operand.vmem [shape: bf16[2,64,32], index: 1, kind: input, shape index: {}]   ;;  %s1727_s2 = inlined_call_operand.vmem [shape: bf16[2,32,64], index: 2, kind: input, shape index: {}]   ;;  %s1728_s3 = inlined_call_operand.vmem [shape: bf16[32,32], index: 3, kind: input, shape index: {}]   ;;  %s1729_s4 = inlined_call_operand.vmem [shape: f32[32,8], index: 4, kind: input, shape index: {}]   ;;  %s1730_s5 = inlined_call_operand.vmem [shape: f32[2,32,256], index: 5, kind: output, shape index: {}]  }
   0x1   :  { %s1411_s20 = smov 0  }
   0x2 LB: > { %s27_s21 = sadd.s32 1, %s1365_s19  ;;  %p1161_p0 = scmp.ge.s32.totalorder %s1369_s20, 1  ;;  %s1369_s20 = sphi %s1411_s20, %s15_s20   ;;  %s1365_s19 = sphi %s1409_s19, %s1732_s19   ;;  %s1361_s18 = sphi %s1407_s18, %s1731_s18  }
   0x3   : > { %p29_p1 = scmp.ge.s32.totalorder %s27_s21, 2  ;;  %p228_p2 = scmp.lt.s32.totalorder %s1369_s20, 3 }
   0x5   : > { %s1734_s21 = smov (%p29_p1, %s27_s21), 0  ;;  %p229_p3 = pnand %p1161_p0, %p228_p2 }
   0x6   : > { %p275_p4 = scmp.lt.s32.totalorder (!%p229_p3), %s1361_s18, 1 }
   0x7   : > { %232 = sbr.rel (%p229_p3) target bundleno = 721 (0x2d1), region = 40 }
   0xc   : > { %v1428_v0 = vld [vmem:[%s1729_s4 + $0x10] sm:$0xff]  ;;  %v1371_v1 = vmov 1   ;;  %v1372_v2 = vmov 0   ;;  %v1435_v3 = vld [vmem:[%s1729_s4] sm:$0xff]  ;;  %v1441_v4 = vld [vmem:[%s1729_s4 + $0x18] sm:$0xff]  ;;  %s1736_s18 = smov (!%p275_p4, %s1361_s18), 1 }
   0xd   : > { %1263 = vset.pattern.permute.xlu1 %v1371_v1  ;;  %1262 = vset.pattern.permute.xlu0 %v1372_v2  ;;  %v1373_v5 = vmov 32.0   ;;  %v1450_v6 = vld [vmem:[%s1729_s4 + $0x8] sm:$0xff]  ;;  %s1220_s30 = sshll.u32 %s1736_s18, 6  ;;  %vm496_vm7 = vcmask 261120   ;;  %s1221_s13 = sshll.u32 %s1736_s18, 5  ;;  %vm937_vm8 = vcmask 523264  }
   0xe   : > { %447 = vperm.xlu1 %1263, %v1428_v0   ;;  %422 = vperm.xlu0 %1262, %v1428_v0   ;;  %1274 = vrcp.f32 %v1373_v5  ;;  %s282_s8 = scalar_lea.vmem %s1725_s0, %s1220_s30  ;;  %s288_s16 = scalar_lea.vmem %s1726_s1, %s1221_s13 }
   0xf   : > { %1264 = vset.pattern.permute.xlu2 %v1372_v2  ;;  %v305_v9 = vld [vmem:[%s282_s8] sm:$0xff]  ;;  %v306_v10 = vld [vmem:[%s282_s8 + $0x8] sm:$0xff]  ;;  %v307_v11 = vld [vmem:[%s282_s8 + $0x10] sm:$0xff]  ;;  %s1222_s27 = sshll.u32 %s1736_s18, 4  ;;  %s1699_s9 = scalar_lea.vmem %s1730_s5, %s1220_s30 }
  0x10   : > { %412 = vperm.xlu2 %1264, %v1435_v3   ;;  %v308_v12 = vld [vmem:[%s282_s8 + $0x18] sm:$0xff]  ;;  %v317_v13 = vadd.f32 %v307_v11, %v305_v9  ;;  %v309_v14 = vld [vmem:[%s282_s8 + $0x20] sm:$0xff]  ;;  %v310_v15 = vld [vmem:[%s282_s8 + $0x28] sm:$0xff]  ;;  %s293_s6 = scalar_lea.vmem %s1727_s2, %s1222_s27 }
  0x11   : > { %v326_v16 = vadd.f32 %v308_v12, %v306_v10  ;;  %v311_v19 = vld [vmem:[%s282_s8 + $0x30] sm:$0xff]  ;;  %v312_v20 = vld [vmem:[%s282_s8 + $0x38] sm:$0xff] }
  0x12   : > { %v318_v17 = vadd.f32 %v317_v13, %v309_v14 }
  0x13   : > { %v327_v21 = vadd.f32 %v326_v16, %v310_v15 }
  0x14   : > { %v1275_v7 = vpop.eup %1274  ;;  %v319_v22 = vadd.f32 %v318_v17, %v311_v19 }
  0x15   : > { %v336_v8 = vmul.f32 32.0, %v1275_v7  ;;  %v328_v23 = vadd.f32 %v327_v21, %v312_v20  ;;  %vm340_vm0 = vweird.f32 %v1275_v7 }
  0x16   : > { %451 = vperm.xlu1 %1263, %v1441_v4   ;;  %427 = vperm.xlu0 %1262, %v1441_v4   ;;  %v320_v24 = vrot.slane %v319_v22, 4 }
  0x17   : > { %v337_v18 = vsub.f32 1.0, %v336_v8  ;;  %v329_v26 = vrot.slane %v328_v23, 4 }
  0x18   : > { %417 = vperm.xlu2 %1264, %v1450_v6   ;;  %v321_v27 = vadd.f32 %v320_v24, %v319_v22 }
  0x19   : > { %v338_v25 = vmul.f32 %v1275_v7, %v337_v18  ;;  %v330_v28 = vadd.f32 %v329_v26, %v328_v23 }
  0x1a   : > { %v322_v29 = vrot.slane %v321_v27, 2 }
  0x1b   : > { %v339_v30 = vadd.f32 %v1275_v7, %v338_v25  ;;  %v331_v31 = vrot.slane %v330_v28, 2 }
  0x1c   : > { %v323_v32 = vadd.f32 %v322_v29, %v321_v27 }
  0x1d   : > { %v332_v33 = vadd.f32 %v331_v31, %v330_v28  ;;  %v341_v35 = vsel %vm340_vm0, %v1275_v7, %v339_v30 }
  0x1e   : > { %1265 = vset.pattern.permute.xlu0 %v1371_v1  ;;  %443 = vperm.xlu1 %1263, %v1450_v6   ;;  %v324_v34 = vrot.slane %v323_v32, 1 }
  0x1f   : > { %439 = vperm.xlu0 %1265, %v1435_v3   ;;  %v333_v36 = vrot.slane %v332_v33, 1 }
  0x20   : > { %v325_v37 = vadd.f32 %v324_v34, %v323_v32 }
  0x21   : > { %v334_v38 = vadd.f32 %v333_v36, %v332_v33 }
  0x22   : > { %v342_v39 = vmul.f32 %v341_v35, %v325_v37 }
  0x23   : > { %v343_v40 = vmul.f32 %v341_v35, %v334_v38 }
  0x24   : > { %v1461_v41 = vsub.f32 %v305_v9, %v342_v39  ;;  %v1463_v42 = vsub.f32 %v307_v11, %v342_v39  ;;  %v348_v45 = vsub.f32 %v309_v14, %v342_v39  ;;  %v350_v51 = vsub.f32 %v311_v19, %v342_v39 }
  0x25   : > { %v1465_v43 = vsub.f32 %v306_v10, %v343_v40  ;;  %v1467_v44 = vsub.f32 %v308_v12, %v343_v40  ;;  %v349_v46 = vsub.f32 %v310_v15, %v343_v40  ;;  %v351_v52 = vsub.f32 %v312_v20, %v343_v40 }
  0x26   : > { %v352_v47 = vmul.f32 %v1461_v41, %v1461_v41  ;;  %v354_v48 = vmul.f32 %v1463_v42, %v1463_v42  ;;  %v356_v53 = vmul.f32 %v348_v45, %v348_v45  ;;  %v358_v57 = vmul.f32 %v350_v51, %v350_v51 }
  0x27   : > { %v353_v49 = vmul.f32 %v1465_v43, %v1465_v43  ;;  %v355_v50 = vmul.f32 %v1467_v44, %v1467_v44  ;;  %v357_v54 = vmul.f32 %v349_v46, %v349_v46  ;;  %v359_v59 = vmul.f32 %v351_v52, %v351_v52 }
  0x28   : > { %v360_v55 = vadd.f32 %v354_v48, %v352_v47 }
  0x29   : > { %v369_v56 = vadd.f32 %v355_v50, %v353_v49 }
  0x2a   : > { %v361_v58 = vadd.f32 %v360_v55, %v356_v53 }
  0x2b   : > { %v370_v60 = vadd.f32 %v369_v56, %v357_v54 }
  0x2c   : > { %v362_v61 = vadd.f32 %v361_v58, %v358_v57  ;;  %v1374_v57 = vmov 2  }
  0x2d   : > { %v371_v62 = vadd.f32 %v370_v60, %v359_v59  ;;  %1268 = vset.pattern.permute.xlu0 %v1374_v57  ;;  %1266 = vset.pattern.permute.xlu2 %v1374_v57 }
  0x2e   : > { %v363_v63 = vrot.slane %v362_v61, 4  ;;  %475 = vperm.xlu0 %1268, %v1450_v6   ;;  %479 = vperm.xlu2 %1266, %v1428_v0  }
  0x2f   : > { %v372_v1 = vrot.slane %v371_v62, 4  ;;  %1267 = vset.pattern.permute.xlu1 %v1374_v57 }
  0x30   : > { %v364_v2 = vadd.f32 %v363_v63, %v362_v61  ;;  %483 = vperm.xlu1 %1267, %v1441_v4  }
  0x31   : > { %v373_v5 = vadd.f32 %v372_v1, %v371_v62 }
  0x32   : > { %v365_v7 = vrot.slane %v364_v2, 2 }
  0x33   : > { %v374_v8 = vrot.slane %v373_v5, 2 }
  0x34   : > { %v366_v9 = vadd.f32 %v365_v7, %v364_v2 }
  0x35   : > { %v375_v10 = vadd.f32 %v374_v8, %v373_v5  ;;  %v1224_v8 = vld [vmem:[%s1728_s3] sm:$0xff] }
  0x36   : > { %v367_v11 = vrot.slane %v366_v9, 1  ;;  %471 = vperm.xlu2 %1266, %v1435_v3  }
  0x37   : > { %v376_v12 = vrot.slane %v375_v10, 1 }
  0x38   : > { %v368_v13 = vadd.f32 %v367_v11, %v366_v9  ;;  %v1225_v9 = vld [vmem:[%s1728_s3 + $0x8] sm:$0xff] }
  0x39   : > { %v377_v14 = vadd.f32 %v376_v12, %v375_v10 }
  0x3a   : > { %v378_v15 = vmul.f32 %v368_v13, %v341_v35 }
  0x3b   : > { %v379_v16 = vmul.f32 %v377_v14, %v341_v35 }
  0x3c   : > { %v380_v17 = vadd.f32 1e-05, %v378_v15 }
  0x3d   : > { %v381_v18 = vadd.f32 1e-05, %v379_v16 }
  0x3e   : > { %1276 = vrsqrt.f32 %v380_v17  ;;  %vm388_vm1 = vweird.f32 %v380_v17 }
  0x3f   : > { %1278 = vrsqrt.f32 %v381_v18  ;;  %vm398_vm3 = vweird.f32 %v381_v18 }
  0x44   : > { %v1277_v19 = vpop.eup %1276 }
  0x45   : > { %v1279_v20 = vpop.eup %1278  ;;  %v383_v21 = vmul.f32 %v1277_v19, %v380_v17  ;;  %vm389_vm2 = vweird.f32 %v1277_v19 }
  0x46   : > { %v393_v22 = vmul.f32 %v1279_v20, %v381_v18  ;;  %vm399_vm4 = vweird.f32 %v1279_v20  ;;  %vm390_vm5 = vmor %vm388_vm1, %vm389_vm2 }
  0x47   : > { %v384_v23 = vmul.f32 %v1277_v19, %v383_v21  ;;  %vm400_vm6 = vmor %vm398_vm3, %vm399_vm4 }
  0x48   : > { %v394_v24 = vmul.f32 %v1279_v20, %v393_v22 }
  0x49   : > { %v385_v25 = vmul.f32 0.5, %v384_v23 }
  0x4a   : > { %v395_v26 = vmul.f32 0.5, %v394_v24 }
  0x4b   : > { %v386_v27 = vsub.f32 1.5, %v385_v25 }
  0x4c   : > { %v396_v28 = vsub.f32 1.5, %v395_v26 }
  0x4d   : > { %v387_v29 = vmul.f32 %v1277_v19, %v386_v27 }
  0x4e   : > { %v397_v30 = vmul.f32 %v1279_v20, %v396_v28 }
  0x4f   : > { %v391_v31 = vsel %vm390_vm5, %v1277_v19, %v387_v29 }
  0x50   : > { %v401_v32 = vsel %vm400_vm6, %v1279_v20, %v397_v30  ;;  %v406_v36 = vmul.f32 %v391_v31, %v348_v45  ;;  %v408_v38 = vmul.f32 %v391_v31, %v350_v51  ;;  %v404_v54 = vmul.f32 %v391_v31, %v1463_v42 }
  0x51   : > { %v407_v37 = vmul.f32 %v401_v32, %v349_v46  ;;  %v409_v39 = vmul.f32 %v401_v32, %v351_v52  ;;  %v405_v55 = vmul.f32 %v401_v32, %v1467_v44  ;;  %v402_v51 = vmul.f32 %v391_v31, %v1461_v41 }
  0x52   : > { %v403_v42 = vmul.f32 %v401_v32, %v1465_v43 }
  0x6a   : > { %v413_v35 = vpop.permute.xlu2 %412 }
  0x6b   : > { %v430_v62 = vmul.f32 %v413_v35, %v402_v51  ;;  %v431_v0 = vmul.f32 %v413_v35, %v403_v42  ;;  %v1227_v35 = vld [vmem:[%s288_s16 + $0x8] sm:$0xff] }
  0x72   : > { %v418_v44 = vpop.permute.xlu2 %417 }
  0x73   : > { %v432_v60 = vmul.f32 %v418_v44, %v404_v54  ;;  %v433_v61 = vmul.f32 %v418_v44, %v405_v55 }
  0x80   : > { %v448_v33 = vpop.permute.xlu1 %447  ;;  %v423_v34 = vpop.permute.xlu0 %422 }
  0x81   : > { %v434_v40 = vmul.f32 %v423_v34, %v406_v36  ;;  %v435_v47 = vmul.f32 %v423_v34, %v407_v37  ;;  %v1226_v34 = vld [vmem:[%s288_s16] sm:$0xff]  ;;  %v1228_v36 = vld [vmem:[%s288_s16 + $0x10] sm:$0xff]  ;;  %v1229_v37 = vld [vmem:[%s288_s16 + $0x18] sm:$0xff] }
  0x83   : > { %v1479_v56 = vadd.f32 %v448_v33, %v434_v40  ;;  %v1483_v45 = vadd.f32 %v448_v33, %v435_v47 }
  0x88   : > { %v452_v48 = vpop.permute.xlu1 %451  ;;  %v428_v49 = vpop.permute.xlu0 %427 }
  0x89   : > { %v436_v50 = vmul.f32 %v428_v49, %v408_v38  ;;  %v437_v53 = vmul.f32 %v428_v49, %v409_v39  ;;  %v480_v14 = vpop.permute.xlu2 %479 }
  0x8b   : > { %v1481_v58 = vadd.f32 %v452_v48, %v436_v50  ;;  %v1485_v46 = vadd.f32 %v452_v48, %v437_v53 }
  0x8d   : > { %v468_v52 = vpack.c.bf16 %v1481_v58, %v1479_v56  ;;  %v469_v59 = vpack.c.bf16 %v1485_v46, %v1483_v45 }
  0x8f   : > { %509 = vmatpush.bf16.msra.mxu0 %v468_v52  ;;  %528 = vmatpush.bf16.msra.mxu1 %v469_v59 }
  0x90   : > { %v444_v63 = vpop.permute.xlu1 %443 }
  0x91   : > { %v1496_v41 = vadd.f32 %v444_v63, %v432_v60  ;;  %v1498_v43 = vadd.f32 %v444_v63, %v433_v61  ;;  %v440_v1 = vpop.permute.xlu0 %439  ;;  %v472_v25 = vpop.permute.xlu2 %471 }
  0x92   : > { %v1500_v2 = vadd.f32 %v440_v1, %v430_v62  ;;  %v1502_v5 = vadd.f32 %v440_v1, %v431_v0 }
  0x94   : > { %v466_v4 = vpack.c.bf16 %v1496_v41, %v1500_v2  ;;  %v467_v7 = vpack.c.bf16 %v1498_v43, %v1502_v5 }
  0x96   : > { %510 = vmatpush.bf16.msra.mxu0 %v466_v4  ;;  %529 = vmatpush.bf16.msra.mxu1 %v467_v7 }
  0x99   : > { %1178 = vmatmul.msk.bf16.vlgmr.msra.gmra.mxu0 %vm496_vm7, %v1224_v8  ;;  %1180 = vmatmul.msk.bf16.vlgmr.msra.gmra.mxu1 %vm496_vm7, %v1224_v8 }
  0xa0   : > { %v476_v18 = vpop.permute.xlu0 %475 }
  0xa2   : > { %v484_v17 = vpop.permute.xlu1 %483 }
  0xa9   : > { %1179 = vmatmul.msk.bf16.gmra.mxu0 %vm496_vm7, %v1225_v9  ;;  %1181 = vmatmul.msk.bf16.gmra.mxu1 %vm496_vm7, %v1225_v9 }
 0x116   : > { %v512_v10 = vpop.f32.mrf.mxu0  ;;  %v531_v11 = vpop.f32.mrf.mxu1 }
 0x117   : > { %v513_v30 = vadd.f32 %v512_v10, %v472_v25  ;;  %v532_v31 = vadd.f32 %v531_v11, %v472_v25 }
 0x11e   : > { %v514_v12 = vpop.f32.mrf.mxu0  ;;  %v533_v13 = vpop.f32.mrf.mxu1 }
 0x11f   : > { %v515_v26 = vadd.f32 %v514_v12, %v476_v18  ;;  %v534_v27 = vadd.f32 %v533_v13, %v476_v18 }
 0x121   : > { %v549_v32 = vpack.c.bf16 %v515_v26, %v513_v30  ;;  %v550_v33 = vpack.c.bf16 %v534_v27, %v532_v31 }
 0x126   : > { %v517_v15 = vpop.f32.mrf.mxu0  ;;  %v536_v16 = vpop.f32.mrf.mxu1 }
 0x127   : > { %v518_v21 = vadd.f32 %v517_v15, %v480_v14  ;;  %v537_v22 = vadd.f32 %v536_v16, %v480_v14 }
 0x12e   : > { %v519_v19 = vpop.f32.mrf.mxu0  ;;  %v538_v20 = vpop.f32.mrf.mxu1 }
 0x12f   : > { %v520_v23 = vadd.f32 %v519_v19, %v484_v17  ;;  %v539_v24 = vadd.f32 %v538_v20, %v484_v17 }
 0x131   : > { %v551_v28 = vpack.c.bf16 %v520_v23, %v518_v21  ;;  %v552_v29 = vpack.c.bf16 %v539_v24, %v537_v22 }
 0x133   : > { %591 = vmatpush.bf16.msra.mxu2 %v551_v28  ;;  %620 = vmatpush.bf16.msra.mxu3 %v552_v29 }
 0x137   : > { %592 = vmatpush.bf16.msra.mxu2 %v549_v32  ;;  %621 = vmatpush.bf16.msra.mxu3 %v550_v33 }
 0x13a   : > { %1198 = vmatmul.msk.bf16.vlgmr.msra.gmra.mxu2 %vm496_vm7, %v1226_v34  ;;  %1202 = vmatmul.msk.bf16.vlgmr.msra.gmra.mxu3 %vm496_vm7, %v1226_v34 }
 0x14a   : > { %1199 = vmatmul.msk.bf16.gmra.mxu2 %vm496_vm7, %v1227_v35  ;;  %1203 = vmatmul.msk.bf16.gmra.mxu3 %vm496_vm7, %v1227_v35 }
 0x15a   : > { %1200 = vmatmul.msk.bf16.gmra.mxu2 %vm496_vm7, %v1228_v36  ;;  %1204 = vmatmul.msk.bf16.gmra.mxu3 %vm496_vm7, %v1228_v36 }
 0x16a   : > { %1201 = vmatmul.msk.bf16.gmra.mxu2 %vm496_vm7, %v1229_v37  ;;  %1205 = vmatmul.msk.bf16.gmra.mxu3 %vm496_vm7, %v1229_v37 }
 0x1bd   : > { %v594_v38 = vpop.f32.mrf.mxu2  ;;  %v623_v39 = vpop.f32.mrf.mxu3 }
 0x1be   : > { %v643_v40 = vrot.slane %v594_v38, 4  ;;  %v649_v47 = vrot.slane %v623_v39, 4 }
 0x1c0   : > { %v644_v48 = vmax.f32 %v594_v38, %v643_v40  ;;  %v650_v49 = vmax.f32 %v623_v39, %v649_v47 }
 0x1c2   : > { %v645_v50 = vrot.slane %v644_v48, 2  ;;  %v651_v54 = vrot.slane %v650_v49, 2 }
 0x1c4   : > { %v646_v53 = vmax.f32 %v644_v48, %v645_v50  ;;  %v652_v52 = vmax.f32 %v650_v49, %v651_v54 }
 0x1c5   : > { %v596_v55 = vpop.f32.mrf.mxu2  ;;  %v1531_v57 = vpop.f32.mrf.mxu3 }
 0x1c6   : > { %v647_v51 = vrot.slane %v646_v53, 1  ;;  %v655_v42 = vrot.slane %v596_v55, 4  ;;  %v661_v62 = vrot.slane %v1531_v57, 4  ;;  %v653_v0 = vrot.slane %v652_v52, 1 }
 0x1c8   : > { %v648_v44 = vmax.f32 %v646_v53, %v647_v51  ;;  %v656_v59 = vmax.f32 %v596_v55, %v655_v42  ;;  %v662_v9 = vmax.f32 %v1531_v57, %v661_v62  ;;  %v654_v11 = vmax.f32 %v652_v52, %v653_v0 }
 0x1ca   : > { %v739_v60 = vsub.f32 %v594_v38, %v648_v44  ;;  %v657_v61 = vrot.slane %v656_v59, 2  ;;  %v663_v14 = vrot.slane %v662_v9, 2  ;;  %v740_v17 = vsub.f32 %v623_v39, %v654_v11 }
 0x1cc   : > { %v658_v63 = vmax.f32 %v656_v59, %v657_v61  ;;  %v755_v7 = vmul.f32 1.442695, %v739_v60  ;;  %v664_v21 = vmax.f32 %v662_v9, %v663_v14  ;;  %v757_v25 = vmul.f32 1.442695, %v740_v17 }
 0x1cd   : > { %v1534_v1 = vpop.f32.mrf.mxu2  ;;  %v1536_v4 = vpop.f32.mrf.mxu3 }
 0x1ce   : > { %v659_v8 = vrot.slane %v658_v63, 1  ;;  %v667_v10 = vrot.slane %v1534_v1, 4  ;;  %1280 = vpow2.f32 %v755_v7  ;;  %v673_v15 = vrot.slane %v1536_v4, 4 }
 0x1cf   : > { %v665_v26 = vrot.slane %v664_v21, 1 }
 0x1d0   : > { %v660_v12 = vmax.f32 %v658_v63, %v659_v8  ;;  %v668_v16 = vmax.f32 %v1534_v1, %v667_v10  ;;  %v674_v22 = vmax.f32 %v1536_v4, %v673_v15 }
 0x1d1   : > { %v666_v36 = vmax.f32 %v664_v21, %v665_v26 }
 0x1d2   : > { %v741_v13 = vsub.f32 %v596_v55, %v660_v12  ;;  %v669_v23 = vrot.slane %v668_v16, 2  ;;  %v675_v27 = vrot.slane %v674_v22, 2 }
 0x1d3   : > { %v742_v51 = vsub.f32 %v1531_v57, %v666_v36 }
 0x1d4   : > { %v759_v18 = vmul.f32 1.442695, %v741_v13  ;;  %v1547_v24 = vpop.eup %1280  ;;  %v670_v28 = vmax.f32 %v668_v16, %v669_v23  ;;  %v676_v37 = vmax.f32 %v674_v22, %v675_v27 }
 0x1d5   : > { %v1542_v19 = vpop.f32.mrf.mxu2  ;;  %v1544_v20 = vpop.f32.mrf.mxu3  ;;  %v787_v30 = vrot.slane %v1547_v24, 4  ;;  %v761_v11 = vmul.f32 1.442695, %v742_v51 }
 0x1d6   : > { %1282 = vpow2.f32 %v759_v18  ;;  %v679_v29 = vrot.slane %v1542_v19, 4  ;;  %v685_v32 = vrot.slane %v1544_v20, 4  ;;  %v671_v39 = vrot.slane %v670_v28, 1 }
 0x1d7   : > { %1284 = vpow2.f32 %v757_v25  ;;  %v788_v48 = vadd.f32 %v1547_v24, %v787_v30  ;;  %v677_v42 = vrot.slane %v676_v37, 1 }
 0x1d8   : > { %v680_v40 = vmax.f32 %v1542_v19, %v679_v29  ;;  %v686_v49 = vmax.f32 %v1544_v20, %v685_v32  ;;  %v672_v52 = vmax.f32 %v670_v28, %v671_v39  ;;  %1286 = vpow2.f32 %v761_v11 }
 0x1d9   : > { %v789_v61 = vrot.slane %v788_v48, 2  ;;  %v678_v12 = vmax.f32 %v676_v37, %v677_v42 }
 0x1da   : > { %v681_v59 = vrot.slane %v680_v40, 2  ;;  %v687_v62 = vrot.slane %v686_v49, 2  ;;  %v743_v57 = vsub.f32 %v1534_v1, %v672_v52 }
 0x1db   : > { %v790_v16 = vadd.f32 %v789_v61, %v788_v48  ;;  %v744_v27 = vsub.f32 %v1536_v4, %v678_v12 }
 0x1dc   : > { %v1551_v31 = vpop.eup %1282  ;;  %v682_v15 = vmax.f32 %v680_v40, %v681_v59  ;;  %v688_v17 = vmax.f32 %v686_v49, %v687_v62  ;;  %v763_v30 = vmul.f32 1.442695, %v743_v57 }
 0x1dd   : > { %v1554_v33 = vpop.f32.mrf.mxu2  ;;  %v1556_v34 = vpop.f32.mrf.mxu3  ;;  %v799_v35 = vrot.slane %v1551_v31, 4 }
 0x1de   : > { %v691_v38 = vrot.slane %v1554_v33, 4  ;;  %v697_v47 = vrot.slane %v1556_v34, 4  ;;  %v1567_v55 = vpop.eup %1284  ;;  %v683_v32 = vrot.slane %v682_v15, 1  ;;  %v689_v36 = vrot.slane %v688_v17, 1 }
 0x1df   : > { %v800_v54 = vadd.f32 %v1551_v31, %v799_v35  ;;  %v793_v10 = vrot.slane %v1567_v55, 4  ;;  %v791_v35 = vrot.slane %v790_v16, 1  ;;  %1288 = vpow2.f32 %v763_v30  ;;  %v1580_v52 = vpop.eup %1286 }
 0x1e0   : > { %v692_v50 = vmax.f32 %v1554_v33, %v691_v38  ;;  %v698_v53 = vmax.f32 %v1556_v34, %v697_v47  ;;  %v684_v51 = vmax.f32 %v682_v15, %v683_v32  ;;  %v690_v59 = vmax.f32 %v688_v17, %v689_v36 }
 0x1e1   : > { %v801_v9 = vrot.slane %v800_v54, 2  ;;  %v794_v26 = vadd.f32 %v1567_v55, %v793_v10  ;;  %v805_v15 = vrot.slane %v1580_v52, 4 }
 0x1e2   : > { %v693_v44 = vrot.slane %v692_v50, 2  ;;  %v699_v60 = vrot.slane %v698_v53, 2 }
 0x1e3   : > { %v802_v25 = vadd.f32 %v801_v9, %v800_v54  ;;  %v795_v49 = vrot.slane %v794_v26, 2 }
 0x1e4   : > { %v694_v0 = vmax.f32 %v692_v50, %v693_v44  ;;  %v700_v63 = vmax.f32 %v698_v53, %v699_v60  ;;  %v765_v50 = vmul.f32 1.442695, %v744_v27  ;;  %v792_v44 = vadd.f32 %v791_v35, %v790_v16 }
 0x1e5   : > { %v606_v7 = vpop.f32.mrf.mxu2  ;;  %v635_v8 = vpop.f32.mrf.mxu3  ;;  %v803_v48 = vrot.slane %v802_v25, 1  ;;  %v746_v16 = vsub.f32 %v1544_v20, %v690_v59  ;;  %v796_v30 = vadd.f32 %v795_v49, %v794_v26 }
 0x1e6   : > { %v703_v13 = vrot.slane %v606_v7, 4  ;;  %v709_v14 = vrot.slane %v635_v8, 4  ;;  %v695_v22 = vrot.slane %v694_v0, 1  ;;  %v701_v23 = vrot.slane %v700_v63, 1 }
 0x1e7   : > { %v804_v10 = vadd.f32 %v803_v48, %v802_v25  ;;  %1290 = vpow2.f32 %v765_v50  ;;  %v769_v32 = vmul.f32 1.442695, %v746_v16  ;;  %v797_v49 = vrot.slane %v796_v30, 1 }
 0x1e8   : > { %v704_v18 = vmax.f32 %v606_v7, %v703_v13  ;;  %v710_v21 = vmax.f32 %v635_v8, %v709_v14  ;;  %v696_v38 = vmax.f32 %v694_v0, %v695_v22  ;;  %v702_v39 = vmax.f32 %v700_v63, %v701_v23 }
 0x1e9   : > { %v745_v14 = vsub.f32 %v1542_v19, %v684_v51  ;;  %1292 = vrcp.f32 %v792_v44 }
 0x1ea   : > { %v705_v28 = vrot.slane %v704_v18, 2  ;;  %v711_v29 = vrot.slane %v710_v21, 2  ;;  %v747_v0 = vsub.f32 %v1554_v33, %v696_v38  ;;  %v748_v63 = vsub.f32 %v1556_v34, %v702_v39 }
 0x1eb   : > { %1294 = vrcp.f32 %v804_v10  ;;  %v806_v39 = vadd.f32 %v1580_v52, %v805_v15  ;;  %v798_v10 = vadd.f32 %v797_v49, %v796_v30 }
 0x1ec   : > { %v706_v1 = vmax.f32 %v704_v18, %v705_v28  ;;  %v712_v37 = vmax.f32 %v710_v21, %v711_v29  ;;  %v1589_v21 = vpop.eup %1288  ;;  %v771_v34 = vmul.f32 1.442695, %v747_v0  ;;  %v773_v22 = vmul.f32 1.442695, %v748_v63 }
 0x1ed   : > { %v1574_v40 = vpop.f32.mrf.mxu2  ;;  %v1576_v47 = vpop.f32.mrf.mxu3  ;;  %v767_v28 = vmul.f32 1.442695, %v745_v14 }
 0x1ee   : > { %v707_v53 = vrot.slane %v706_v1, 1  ;;  %v713_v54 = vrot.slane %v712_v37, 1  ;;  %v715_v4 = vrot.slane %v1574_v40, 4  ;;  %v721_v42 = vrot.slane %v1576_v47, 4  ;;  %v1591_v20 = vpop.eup %1290 }
 0x1f0   : > { %v708_v60 = vmax.f32 %v706_v1, %v707_v53  ;;  %v714_v61 = vmax.f32 %v712_v37, %v713_v54  ;;  %v716_v62 = vmax.f32 %v1574_v40, %v715_v4  ;;  %v722_v9 = vmax.f32 %v1576_v47, %v721_v42  ;;  %v1293_v37 = vpop.eup %1292 }
 0x1f1   : > { %v1295_v54 = vpop.eup %1294  ;;  %v1613_v15 = vmul.f32 %v1293_v37, %v1547_v24 }
 0x1f2   : > { %v749_v11 = vsub.f32 %v606_v7, %v708_v60  ;;  %v750_v12 = vsub.f32 %v635_v8, %v714_v61  ;;  %v717_v13 = vrot.slane %v716_v62, 2  ;;  %v723_v57 = vrot.slane %v722_v9, 2 }
 0x1f4   : > { %v775_v17 = vmul.f32 1.442695, %v749_v11  ;;  %v777_v18 = vmul.f32 1.442695, %v750_v12  ;;  %v718_v33 = vmax.f32 %v716_v62, %v717_v13  ;;  %v724_v23 = vmax.f32 %v722_v9, %v723_v57 }
 0x1f5   : > { %v611_v25 = vpop.f32.mrf.mxu2  ;;  %v640_v7 = vpop.f32.mrf.mxu3  ;;  %v807_v62 = vrot.slane %v806_v39, 2 }
 0x1f6   : > { %1296 = vpow2.f32 %v775_v17  ;;  %v719_v8 = vrot.slane %v718_v33, 1  ;;  %v727_v19 = vrot.slane %v611_v25, 4  ;;  %v733_v27 = vrot.slane %v640_v7, 4 }
 0x1f7   : > { %1298 = vpow2.f32 %v777_v18  ;;  %v725_v29 = vrot.slane %v724_v23, 1  ;;  %v808_v16 = vadd.f32 %v807_v62, %v806_v39 }
 0x1f8   : > { %v720_v35 = vmax.f32 %v718_v33, %v719_v8  ;;  %v728_v36 = vmax.f32 %v611_v25, %v727_v19  ;;  %v734_v1 = vmax.f32 %v640_v7, %v733_v27  ;;  %1300 = vpow2.f32 %v771_v34 }
 0x1f9   : > { %v726_v38 = vmax.f32 %v724_v23, %v725_v29  ;;  %1302 = vpow2.f32 %v773_v22  ;;  %v811_v23 = vrot.slane %v1589_v21, 4 }
 0x1fa   : > { %v751_v48 = vsub.f32 %v1574_v40, %v720_v35  ;;  %v729_v50 = vrot.slane %v728_v36, 2  ;;  %v735_v53 = vrot.slane %v734_v1, 2  ;;  %1304 = vpow2.f32 %v767_v28 }
 0x1fb   : > { %v752_v26 = vsub.f32 %v1576_v47, %v726_v38  ;;  %1306 = vpow2.f32 %v769_v32  ;;  %v1605_v47 = vmul.f32 %v1295_v54, %v1551_v31  ;;  %v809_v35 = vrot.slane %v808_v16, 1 }
 0x1fc   : > { %v1596_v4 = vpop.eup %1296  ;;  %v779_v51 = vmul.f32 1.442695, %v751_v48  ;;  %v730_v42 = vmax.f32 %v728_v36, %v729_v50  ;;  %v736_v44 = vmax.f32 %v734_v1, %v735_v53  ;;  %v812_v53 = vadd.f32 %v1589_v21, %v811_v23 }
 0x1fd   : > { %v1598_v59 = vpop.eup %1298  ;;  %v781_v60 = vmul.f32 1.442695, %v752_v26  ;;  %v847_v61 = vrot.slane %v1596_v4, 4  ;;  %v919_v8 = vpack.c.bf16 %v1605_v47, %v1613_v15  ;;  %v810_v48 = vadd.f32 %v809_v35, %v808_v16 }
 0x1fe   : > { %1308 = vpow2.f32 %v779_v51  ;;  %v731_v40 = vrot.slane %v730_v42, 1  ;;  %v737_v0 = vrot.slane %v736_v44, 1  ;;  %v853_v63 = vrot.slane %v1598_v59, 4  ;;  %v1602_v9 = vpop.eup %1300 }
 0x1ff   : > { %1310 = vpow2.f32 %v781_v60  ;;  %v1607_v11 = vpop.eup %1302  ;;  %v848_v57 = vadd.f32 %v1596_v4, %v847_v61  ;;  %v835_v31 = vrot.slane %v1602_v9, 4 }
 0x200   : > { %v732_v12 = vmax.f32 %v730_v42, %v731_v40  ;;  %v738_v13 = vmax.f32 %v736_v44, %v737_v0  ;;  %v1609_v14 = vpop.eup %1304  ;;  %v854_v34 = vadd.f32 %v1598_v59, %v853_v63  ;;  %v841_v22 = vrot.slane %v1607_v11, 4 }
 0x201   : > { %v1615_v17 = vpop.eup %1306  ;;  %1312 = vrcp.f32 %v798_v10  ;;  %v823_v28 = vrot.slane %v1609_v14, 4  ;;  %v849_v30 = vrot.slane %v848_v57, 2  ;;  %v836_v1 = vadd.f32 %v1602_v9, %v835_v31 }
 0x202   : > { %v753_v18 = vsub.f32 %v611_v25, %v732_v12  ;;  %v754_v33 = vsub.f32 %v640_v7, %v738_v13  ;;  %v817_v25 = vrot.slane %v1591_v20, 4  ;;  %v829_v32 = vrot.slane %v1615_v17, 4 }
 0x203   : > { %v855_v37 = vrot.slane %v854_v34, 2  ;;  %v842_v39 = vadd.f32 %v1607_v11, %v841_v22  ;;  %v850_v51 = vadd.f32 %v849_v30, %v848_v57  ;;  %v824_v42 = vadd.f32 %v1609_v14, %v823_v28 }
 0x204   : > { %v1623_v19 = vpop.eup %1308  ;;  %v783_v24 = vmul.f32 1.442695, %v753_v18  ;;  %v785_v27 = vmul.f32 1.442695, %v754_v33  ;;  %v818_v54 = vadd.f32 %v1591_v20, %v817_v25  ;;  %v830_v44 = vadd.f32 %v1615_v17, %v829_v32 }
 0x205   : > { %v1627_v7 = vpop.eup %1310  ;;  %v859_v29 = vrot.slane %v1623_v19, 4  ;;  %v837_v61 = vrot.slane %v836_v1, 2  ;;  %v856_v62 = vadd.f32 %v855_v37, %v854_v34  ;;  %v843_v0 = vrot.slane %v842_v39, 2 }
 0x206   : > { %1314 = vpow2.f32 %v783_v24  ;;  %v865_v36 = vrot.slane %v1627_v7, 4  ;;  %v813_v12 = vrot.slane %v812_v53, 2  ;;  %v819_v13 = vrot.slane %v818_v54, 2 }
 0x207   : > { %1316 = vpow2.f32 %v785_v27  ;;  %v860_v38 = vadd.f32 %v1623_v19, %v859_v29  ;;  %v1313_v26 = vpop.eup %1312  ;;  %v851_v57 = vrot.slane %v850_v51, 1  ;;  %v825_v33 = vrot.slane %v824_v42, 2 }
 0x208   : > { %v866_v50 = vadd.f32 %v1627_v7, %v865_v36  ;;  %1318 = vrcp.f32 %v810_v48  ;;  %v831_v31 = vrot.slane %v830_v44, 2  ;;  %v838_v23 = vadd.f32 %v837_v61, %v836_v1 }
 0x209   : > { %v861_v49 = vrot.slane %v860_v38, 2  ;;  %v857_v24 = vrot.slane %v856_v62, 1  ;;  %v844_v25 = vadd.f32 %v843_v0, %v842_v39  ;;  %v814_v30 = vadd.f32 %v813_v12, %v812_v53 }
 0x20a   : > { %v867_v60 = vrot.slane %v866_v50, 2  ;;  %v820_v32 = vadd.f32 %v819_v13, %v818_v54  ;;  %v1649_v35 = vmul.f32 %v1313_v26, %v1567_v55  ;;  %v826_v48 = vadd.f32 %v825_v33, %v824_v42 }
 0x20b   : > { %v862_v40 = vadd.f32 %v861_v49, %v860_v38  ;;  %v852_v38 = vadd.f32 %v851_v57, %v850_v51  ;;  %v839_v1 = vrot.slane %v838_v23, 1  ;;  %v1375_v51 = vmov 3  }
 0x20c   : > { %v1640_v63 = vpop.eup %1314  ;;  %v868_v10 = vadd.f32 %v867_v60, %v866_v50  ;;  %v832_v50 = vadd.f32 %v831_v31, %v830_v44  ;;  %v858_v60 = vadd.f32 %v857_v24, %v856_v62  ;;  %v827_v26 = vrot.slane %v826_v48, 1  ;;  %1269 = vset.pattern.permute.xlu1 %v1375_v51  ;;  %1270 = vset.pattern.permute.xlu2 %v1375_v51 }
 0x20d   : > { %v1642_v16 = vpop.eup %1316  ;;  %v871_v18 = vrot.slane %v1640_v63, 4  ;;  %v863_v34 = vrot.slane %v862_v40, 1  ;;  %1320 = vrcp.f32 %v852_v38  ;;  %v1376_v42 = vmov 4   ;;  %983 = vperm.xlu1 %1269, %v1435_v3   ;;  %987 = vperm.xlu2 %1270, %v1450_v6  }
 0x20e   : > { %v877_v22 = vrot.slane %v1642_v16, 4  ;;  %v869_v28 = vrot.slane %v868_v10, 1  ;;  %v1319_v36 = vpop.eup %1318  ;;  %1271 = vset.pattern.permute.xlu0 %v1376_v42  ;;  %1322 = vrcp.f32 %v858_v60  ;;  %v821_v57 = vrot.slane %v820_v32, 1 }
 0x20f   : > { %v872_v27 = vadd.f32 %v1640_v63, %v871_v18  ;;  %v1652_v61 = vmul.f32 %v1319_v36, %v1580_v52  ;;  %v864_v18 = vadd.f32 %v863_v34, %v862_v40  ;;  %v833_v52 = vrot.slane %v832_v50, 1  ;;  %1015 = vperm.xlu0 %1271, %v1435_v3  }
 0x210   : > { %v878_v29 = vadd.f32 %v1642_v16, %v877_v22  ;;  %v870_v0 = vadd.f32 %v869_v28, %v868_v10  ;;  %v845_v22 = vrot.slane %v844_v25, 1  ;;  %v840_v40 = vadd.f32 %v839_v1, %v838_v23 }
 0x211   : > { %v873_v37 = vrot.slane %v872_v27, 2  ;;  %v920_v55 = vpack.c.bf16 %v1652_v61, %v1649_v35  ;;  %1324 = vrcp.f32 %v864_v18  ;;  %v815_v10 = vrot.slane %v814_v30, 1 }
 0x212   : > { %v879_v49 = vrot.slane %v878_v29, 2  ;;  %1326 = vrcp.f32 %v870_v0  ;;  %v846_v13 = vadd.f32 %v845_v22, %v844_v25  ;;  %v828_v33 = vadd.f32 %v827_v26, %v826_v48  ;;  %v1344_v25 = vld [vmem:[%s1729_s4 + $0x10] sm:$0xff] }
 0x213   : > { %v874_v39 = vadd.f32 %v873_v37, %v872_v27  ;;  %v834_v31 = vadd.f32 %v833_v52, %v832_v50  ;;  %v1321_v24 = vpop.eup %1320  ;;  %v816_v34 = vadd.f32 %v815_v10, %v814_v30  ;;  %v822_v3 = vadd.f32 %v821_v57, %v820_v32  ;;  %v1345_v30 = vld [vmem:[%s1729_s4 + $0x18] sm:$0xff] }
 0x214   : > { %v880_v53 = vadd.f32 %v879_v49, %v878_v29  ;;  %v1323_v27 = vpop.eup %1322  ;;  %v909_v1 = vmul.f32 %v1321_v24, %v1596_v4 }
 0x215   : > { %v875_v54 = vrot.slane %v874_v39, 1  ;;  %991 = vperm.xlu1 %1269, %v1344_v25   ;;  %995 = vperm.xlu2 %1270, %v1345_v30  }
 0x216   : > { %v881_v44 = vrot.slane %v880_v53, 1 }
 0x217   : > { %v876_v62 = vadd.f32 %v875_v54, %v874_v39  ;;  %v1325_v28 = vpop.eup %1324 }
 0x218   : > { %v882_v12 = vadd.f32 %v881_v44, %v880_v53  ;;  %v1327_v23 = vpop.eup %1326  ;;  %v911_v36 = vmul.f32 %v1325_v28, %v1623_v19  ;;  %v910_v19 = vmul.f32 %v1323_v27, %v1598_v59  ;;  %v1346_v59 = vld [vmem:[%s1729_s4 + $0x8] sm:$0xff] }
 0x219   : > { %1328 = vrcp.f32 %v876_v62  ;;  %v912_v38 = vmul.f32 %v1327_v23, %v1627_v7 }
 0x21a   : > { %1330 = vrcp.f32 %v882_v12 }
 0x21b   : > { %1332 = vrcp.f32 %v840_v40 }
 0x21c   : > { %1334 = vrcp.f32 %v846_v13 }
 0x21d   : > { %1336 = vrcp.f32 %v828_v33  ;;  %1272 = vset.pattern.permute.xlu1 %v1376_v42  ;;  %1273 = vset.pattern.permute.xlu2 %v1376_v42 }
 0x21e   : > { %1338 = vrcp.f32 %v834_v31  ;;  %1019 = vperm.xlu1 %1272, %v1346_v59   ;;  %1023 = vperm.xlu2 %1273, %v1344_v25  }
 0x21f   : > { %v1329_v6 = vpop.eup %1328  ;;  %1340 = vrcp.f32 %v816_v34 }
 0x220   : > { %v1331_v29 = vpop.eup %1330  ;;  %v913_v37 = vmul.f32 %v1329_v6, %v1640_v63  ;;  %1342 = vrcp.f32 %v822_v3 }
 0x221   : > { %v1333_v32 = vpop.eup %1332  ;;  %v914_v48 = vmul.f32 %v1331_v29, %v1642_v16 }
 0x222   : > { %v1335_v50 = vpop.eup %1334  ;;  %v925_v49 = vpack.c.bf16 %v913_v37, %v911_v36  ;;  %v907_v39 = vmul.f32 %v1333_v32, %v1602_v9 }
 0x223   : > { %v1337_v60 = vpop.eup %1336  ;;  %v926_v18 = vpack.c.bf16 %v914_v48, %v912_v38  ;;  %v908_v22 = vmul.f32 %v1335_v50, %v1607_v11 }
 0x224   : > { %v1339_v63 = vpop.eup %1338  ;;  %948 = vmatpush.bf16.msrb.mxu0 %v925_v49  ;;  %v923_v53 = vpack.c.bf16 %v909_v1, %v907_v39  ;;  %v905_v16 = vmul.f32 %v1337_v60, %v1609_v14 }
 0x225   : > { %v1341_v0 = vpop.eup %1340  ;;  %967 = vmatpush.bf16.msrb.mxu1 %v926_v18  ;;  %v924_v4 = vpack.c.bf16 %v910_v19, %v908_v22  ;;  %v906_v54 = vmul.f32 %v1339_v63, %v1615_v17  ;;  %v1230_v17 = vld [vmem:[%s293_s6] sm:$0xff] }
 0x226   : > { %v1343_v7 = vpop.eup %1342  ;;  %v903_v9 = vmul.f32 %v1341_v0, %v1589_v21  ;;  %1027 = vperm.xlu1 %1272, %v1345_v30   ;;  %v1231_v21 = vld [vmem:[%s293_s6 + $0x8] sm:$0xff] }
 0x227   : > { %v904_v11 = vmul.f32 %v1343_v7, %v1591_v20 }
 0x228   : > { %949 = vmatpush.bf16.msrb.mxu0 %v923_v53  ;;  %v921_v14 = vpack.c.bf16 %v905_v16, %v903_v9 }
 0x229   : > { %968 = vmatpush.bf16.msrb.mxu1 %v924_v4  ;;  %v922_v26 = vpack.c.bf16 %v906_v54, %v904_v11 }
 0x22c   : > { %950 = vmatpush.bf16.msrb.mxu0 %v921_v14 }
 0x22d   : > { %969 = vmatpush.bf16.msrb.mxu1 %v922_v26 }
 0x230   : > { %951 = vmatpush.bf16.msrb.mxu0 %v919_v8 }
 0x231   : > { %970 = vmatpush.bf16.msrb.mxu1 %v920_v55 }
 0x233   : > { %1214 = vmatmul.msk.bf16.vlgmr.msrb.gmra.mxu0 %vm937_vm8, %v1230_v17 }
 0x234   : > { %1216 = vmatmul.msk.bf16.vlgmr.msrb.gmra.mxu1 %vm937_vm8, %v1230_v17 }
 0x243   : > { %1215 = vmatmul.msk.bf16.gmra.mxu0 %vm937_vm8, %v1231_v21 }
 0x244   : > { %1217 = vmatmul.msk.bf16.gmra.mxu1 %vm937_vm8, %v1231_v21 }
 0x267   : > { %v988_v51 = vpop.permute.xlu2 %987 }
 0x26f   : > { %v996_v10 = vpop.permute.xlu2 %995 }
 0x278   : > { %v1024_v23 = vpop.permute.xlu2 %1023 }
 0x27f   : > { %v984_v20 = vpop.permute.xlu1 %983 }
 0x281   : > { %v1016_v47 = vpop.permute.xlu0 %1015 }
 0x287   : > { %v992_v44 = vpop.permute.xlu1 %991 }
 0x290   : > { %v1020_v57 = vpop.permute.xlu1 %1019 }
 0x298   : > { %v1028_v38 = vpop.permute.xlu1 %1027 }
 0x2b0   : > { %v953_v42 = vpop.f32.mrf.mxu0 }
 0x2b1   : > { %v998_v52 = vmul.f32 %v984_v20, %v953_v42  ;;  %v972_v62 = vpop.f32.mrf.mxu1 }
 0x2b2   : > { %v999_v40 = vmul.f32 %v984_v20, %v972_v62 }
 0x2b3   : > { %v1006_v15 = vadd.f32 %v998_v52, %v1500_v2 }
 0x2b4   : > { %v1007_v8 = vadd.f32 %v999_v40, %v1502_v5 }
 0x2b5   : > { %v1030_v35 = vadd.f32 %v1016_v47, %v1006_v15 }
 0x2b6   : > { %v1031_v61 = vadd.f32 %v1016_v47, %v1007_v8 }
 0x2b7   : > { %1038 = vst [vmem:[%s1699_s9] sm:$0xff] %v1030_v35 }
 0x2b8   : > { %1039 = vst [vmem:[%s1699_s9 + $0x8] sm:$0xff] %v1031_v61  ;;  %v955_v55 = vpop.f32.mrf.mxu0 }
 0x2b9   : > { %v1000_v12 = vmul.f32 %v988_v51, %v955_v55  ;;  %v974_v2 = vpop.f32.mrf.mxu1 }
 0x2ba   : > { %v1001_v13 = vmul.f32 %v988_v51, %v974_v2 }
 0x2bb   : > { %v1008_v33 = vadd.f32 %v1000_v12, %v1496_v41 }
 0x2bc   : > { %v1009_v31 = vadd.f32 %v1001_v13, %v1498_v43 }
 0x2bd   : > { %v1032_v24 = vadd.f32 %v1020_v57, %v1008_v33 }
 0x2be   : > { %v1033_v34 = vadd.f32 %v1020_v57, %v1009_v31 }
 0x2bf   : > { %1040 = vst [vmem:[%s1699_s9 + $0x10] sm:$0xff] %v1032_v24 }
 0x2c0   : > { %1041 = vst [vmem:[%s1699_s9 + $0x18] sm:$0xff] %v1033_v34  ;;  %v958_v5 = vpop.f32.mrf.mxu0 }
 0x2c1   : > { %v1002_v27 = vmul.f32 %v992_v44, %v958_v5  ;;  %v977_v3 = vpop.f32.mrf.mxu1 }
 0x2c2   : > { %v1003_v28 = vmul.f32 %v992_v44, %v977_v3 }
 0x2c3   : > { %v1010_v25 = vadd.f32 %v1002_v27, %v1479_v56 }
 0x2c4   : > { %v1011_v6 = vadd.f32 %v1003_v28, %v1483_v45 }
 0x2c5   : > { %v1034_v29 = vadd.f32 %v1024_v23, %v1010_v25 }
 0x2c6   : > { %v1035_v41 = vadd.f32 %v1024_v23, %v1011_v6 }
 0x2c7   : > { %1042 = vst [vmem:[%s1699_s9 + $0x20] sm:$0xff] %v1034_v29 }
 0x2c8   : > { %1043 = vst [vmem:[%s1699_s9 + $0x28] sm:$0xff] %v1035_v41  ;;  %v960_v43 = vpop.f32.mrf.mxu0 }
 0x2c9   : > { %v1004_v36 = vmul.f32 %v996_v10, %v960_v43  ;;  %v979_v37 = vpop.f32.mrf.mxu1 }
 0x2ca   : > { %v1005_v30 = vmul.f32 %v996_v10, %v979_v37 }
 0x2cb   : > { %v1012_v32 = vadd.f32 %v1004_v36, %v1481_v58 }
 0x2cc   : > { %v1013_v48 = vadd.f32 %v1005_v30, %v1485_v46 }
 0x2cd   : > { %v1036_v50 = vadd.f32 %v1028_v38, %v1012_v32 }
 0x2ce   : > { %v1037_v49 = vadd.f32 %v1028_v38, %v1013_v48 }
 0x2cf   : > { %1044 = vst [vmem:[%s1699_s9 + $0x30] sm:$0xff] %v1036_v50 }
 0x2d0   : > { %1045 = vst [vmem:[%s1699_s9 + $0x38] sm:$0xff] %v1037_v49 }
 0x2d1 PF: > { %s15_s20 = sadd.s32 1, %s1369_s20   ;;  %s1731_s18 = smov %s1365_s19 }
 0x2d2   : > { %p12_p5 = scmp.ge.s32.totalorder %s15_s20, 4   ;;  %s1732_s19 = smov %s1734_s21 }
 0x2d4   :  { %14 = sbr.rel (!%p12_p5) target bundleno = 2 (0x2), region = 76 }

</bundles_post_ra>
